<compile_context>
chip_gen: v7x
topology: tpu7x:2x2x1
jax: 0.10.0
libtpu: 0.0.40
codegen_flags: <defaults>
</compile_context>

<pallas_src>
import math

import jax
import jax.numpy as jnp
from jax.experimental import pallas as pl
from jax.experimental.pallas import tpu as pltpu


def _round_up(x, m):
    return ((x + m - 1) // m) * m


def _choose_tile_b(B):
    """Pick the batch tile (multiple of 128).

    This workload is overhead/DMA bound, not MXU bound, so tiles should be as
    big as practical; for large batches keep ~4 balanced tiles so both v7x
    TensorCores get work on the "parallel" batch axis.
    """
    if B <= 1024:
        return _round_up(max(B, 8), 128)            # single tile
    quarter = _round_up(pl.cdiv(B, 4), 128)          # aim for ~4 balanced tiles
    return int(min(8192, max(1024, quarter)))


def _link_pred_kernel(h_ref, t_ref, r_ref, wh_ref, wt_ref, wr_ref,
                      bh_ref, bt_ref, br_ref, bias_ref,
                      scores_ref, probs_ref, preds_ref):
    """One batch tile of the DistMult link-prediction head.

    h_ref/t_ref : [TILE_B, E]   streamed entity embeddings (bf16/f32)
    r_ref       : [TILE_B, R]   streamed relation embeddings
    w*_ref      : [E|R, H]      resident projection weights
    b*_ref      : [1, H]        resident projection biases (f32)
    bias_ref    : SMEM [1]      scalar score bias
    scores_ref  : [1, TILE_B]   lane-dense scores (f32)
    probs_ref   : [1, TILE_B]   sigmoid(scores)
    preds_ref   : [1, TILE_B]   (probs > 0.5) as int32
    """
    f32 = jnp.float32
    # Three small natural-layout matmuls on the MXU, f32 accumulation.
    hp = jnp.dot(h_ref[...], wh_ref[...], preferred_element_type=f32) + bh_ref[...]
    tp = jnp.dot(t_ref[...], wt_ref[...], preferred_element_type=f32) + bt_ref[...]
    rp = jnp.dot(r_ref[...], wr_ref[...], preferred_element_type=f32) + br_ref[...]
    # TODO(synk): nn.Dropout on hp/tp is identity in eval mode; training-mode
    # dropout is not implemented here.
    prod = hp * rp * tp                                      # [TILE_B, H] f32
    scores = jnp.sum(prod, axis=-1) + bias_ref[0]            # [TILE_B]
    # Cheap in-kernel relayout to a lane-dense [1, TILE_B] row (unmasked vst).
    row = scores.reshape(1, -1)
    probs = jax.nn.sigmoid(row)                              # exp on EUP: free slot
    scores_ref[...] = row
    probs_ref[...] = probs
    preds_ref[...] = (probs > 0.5).astype(jnp.int32)


def _pallas_distmult_head(head, tail, rel_embeds, params, compute_dtype):
    B, E = head.shape
    R = rel_embeds.shape[1]
    H = params["wh"].shape[1]

    TILE_B = _choose_tile_b(B)
    B_pad = _round_up(B, TILE_B)
    num_tiles = B_pad // TILE_B

    f32 = jnp.float32
    cdt = compute_dtype

    def pad_b(x):
        x = x.astype(cdt)
        if B_pad == B:
            return x
        return jnp.pad(x, ((0, B_pad - B), (0, 0)))

    # Streamed activations keep their natural layout (no concat/transpose round
    # trip); bf16 halves HBM traffic and tile footprint.
    h_p = pad_b(head)
    t_p = pad_b(tail)
    r_p = pad_b(rel_embeds)

    wh = params["wh"].astype(cdt)
    wt = params["wt"].astype(cdt)
    wr = params["wr"].astype(cdt)
    bh = params["bh"].astype(f32).reshape(1, H)
    bt = params["bt"].astype(f32).reshape(1, H)
    br = params["br"].astype(f32).reshape(1, H)
    bias = params["bias"].astype(f32)

    in_bytes = jnp.dtype(cdt).itemsize
    # Cost / VMEM bookkeeping (re-derived for bf16 tiles + larger TILE_B).
    flops = 2 * B_pad * H * (2 * E + R) + 4 * B_pad * H
    bytes_accessed = ((B_pad + H) * (2 * E + R)) * in_bytes + 3 * B_pad * 4
    vmem_est = (2 * 2 * TILE_B * (2 * E + R) * in_bytes   # double-buffered act tiles
                + (2 * E + R) * H * in_bytes + 3 * H * 4  # resident weights / biases
                + 4 * TILE_B * H * 4                      # f32 proj + product slabs
                + 2 * 3 * TILE_B * 4)                     # double-buffered output rows
    # Never ask for more than 48 MiB: keep headroom on v7x (64 MiB physical).
    vmem_limit = int(min(48 * 1024 * 1024, max(4 * vmem_est, 16 * 1024 * 1024)))

    def act_spec(d):
        return pl.BlockSpec((TILE_B, d), lambda i: (i, 0))     # streamed per tile

    def res_spec(r, c):
        return pl.BlockSpec((r, c), lambda i: (0, 0))          # resident in VMEM

    out_spec = pl.BlockSpec((1, TILE_B), lambda i: (0, i))     # lane-dense rows

    scores_row, probs_row, preds_row = pl.pallas_call(
        _link_pred_kernel,
        out_shape=(jax.ShapeDtypeStruct((1, B_pad), f32),
                   jax.ShapeDtypeStruct((1, B_pad), f32),
                   jax.ShapeDtypeStruct((1, B_pad), jnp.int32)),
        grid=(num_tiles,),
        in_specs=[
            act_spec(E), act_spec(E), act_spec(R),
            res_spec(E, H), res_spec(E, H), res_spec(R, H),
            res_spec(1, H), res_spec(1, H), res_spec(1, H),
            pl.BlockSpec(memory_space=pltpu.MemorySpace.SMEM),  # scalar score bias
        ],
        out_specs=(out_spec, out_spec, out_spec),
        compiler_params=pltpu.CompilerParams(
            dimension_semantics=("parallel",),
            vmem_limit_bytes=vmem_limit),
        cost_estimate=pl.CostEstimate(
            flops=flops, transcendentals=B_pad, bytes_accessed=bytes_accessed),
    )(h_p, t_p, r_p, wh, wt, wr, bh, bt, br, bias)

    return scores_row[0, :B], probs_row[0, :B], preds_row[0, :B]


def link_prediction_forward(head_embeddings, tail_embeddings, relation_ids, params,
                            return_embeddings=False, use_pallas=None,
                            compute_dtype=jnp.bfloat16):
    # Embedding lookup (glue, not the hot path).
    rel_embeds = params["relation_embeddings"][relation_ids]      # [B, R]
    B = head_embeddings.shape[0]

    if use_pallas is None:
        # Per-pallas_call fixed overhead dwarfs the work at tiny batches.
        use_pallas = B >= 1024

    if use_pallas:
        scores, probs, preds = _pallas_distmult_head(
            head_embeddings, tail_embeddings, rel_embeds, params, compute_dtype)
    else:
        hp = head_embeddings @ params["wh"] + params["bh"]
        tp = tail_embeddings @ params["wt"] + params["bt"]
        rp = rel_embeds @ params["wr"] + params["br"]
        scores = jnp.sum(hp * rp * tp, axis=-1) + params["bias"][0]
        probs = jax.nn.sigmoid(scores)
        preds = (probs > 0.5).astype(jnp.int32)

    out = {
        "scores": scores,
        "logits": scores,
        "probabilities": probs,
        "predictions": preds,
    }
    if return_embeddings:
        # Only materialized when requested (plain JAX; not the hot path).
        out["head_embeddings"] = head_embeddings @ params["wh"] + params["bh"]
        out["tail_embeddings"] = tail_embeddings @ params["wt"] + params["bt"]
        out["relation_embeddings"] = rel_embeds
    return out


def _xavier_uniform(key, shape):
    fan_in, fan_out = shape[0], shape[1]
    bound = math.sqrt(6.0 / (fan_in + fan_out))
    return jax.random.uniform(key, shape, jnp.float32, -bound, bound)


def init_params(key, entity_dim, relation_dim, hidden_dim, num_relations):
    ks = jax.random.split(key, 8)
    params = {
        # nn.Embedding(num_relations, relation_dim), xavier_uniform
        "relation_embeddings": _xavier_uniform(ks[0], (num_relations, relation_dim)),
        # entity_proj_head / entity_proj_tail / relation_proj weights ([in, out])
        "wh": _xavier_uniform(ks[1], (entity_dim, hidden_dim)),
        "wt": _xavier_uniform(ks[2], (entity_dim, hidden_dim)),
        "wr": _xavier_uniform(ks[3], (relation_dim, hidden_dim)),
        # linear biases (PyTorch default: uniform(-1/sqrt(fan_in), 1/sqrt(fan_in)))
        "bh": jax.random.uniform(ks[4], (1, hidden_dim), jnp.float32,
                                 -1.0 / math.sqrt(entity_dim), 1.0 / math.sqrt(entity_dim)),
        "bt": jax.random.uniform(ks[5], (1, hidden_dim), jnp.float32,
                                 -1.0 / math.sqrt(entity_dim), 1.0 / math.sqrt(entity_dim)),
        "br": jax.random.uniform(ks[6], (1, hidden_dim), jnp.float32,
                                 -1.0 / math.sqrt(relation_dim), 1.0 / math.sqrt(relation_dim)),
        # scalar output bias, zeros(1)
        "bias": jnp.zeros((1,), jnp.float32),
    }
    return params


def _reference_scores(head, tail, relation_ids, params, compute_dtype=jnp.float32):
    """Pure-JAX reference. compute_dtype=bf16 mirrors the kernel's
    bf16-operand / f32-accumulate numerics."""
    f32 = jnp.float32
    rel = params["relation_embeddings"][relation_ids]
    cdt = compute_dtype
    hp = jnp.dot(head.astype(cdt), params["wh"].astype(cdt),
                 preferred_element_type=f32) + params["bh"]
    tp = jnp.dot(tail.astype(cdt), params["wt"].astype(cdt),
                 preferred_element_type=f32) + params["bt"]
    rp = jnp.dot(rel.astype(cdt), params["wr"].astype(cdt),
                 preferred_element_type=f32) + params["br"]
    return jnp.sum(hp * rp * tp, axis=-1) + params["bias"][0]


if __name__ == "__main__":
    entity_dim = 32
    relation_dim = 32
    hidden_dim = 64
    num_relations = 50

    key = jax.random.PRNGKey(0)
    kp, kh, kt, kr, kh2, kt2, kr2 = jax.random.split(key, 7)
    params = init_params(kp, entity_dim, relation_dim, hidden_dim, num_relations)

    # ---- Small batch, f32 compute path: tight check vs f32 reference ----
    B = 8
    head = jax.random.normal(kh, (B, entity_dim), jnp.float32)
    tail = jax.random.normal(kt, (B, entity_dim), jnp.float32)
    relation_ids = jax.random.randint(kr, (B,), 0, num_relations)

    out = link_prediction_forward(head, tail, relation_ids, params,
                                  use_pallas=True, compute_dtype=jnp.float32)
    jax.block_until_ready(out["scores"])
    ref = _reference_scores(head, tail, relation_ids, params)
    assert out["scores"].shape == (B,)
    assert jnp.allclose(out["scores"], ref, atol=2e-3, rtol=2e-3), \
        "score mismatch vs reference (small, f32)"
    assert jnp.allclose(out["probabilities"], jax.nn.sigmoid(ref),
                        atol=2e-3, rtol=2e-3), "probability mismatch (small, f32)"
    assert out["predictions"].dtype == jnp.int32
    assert jnp.array_equal(out["predictions"],
                           (out["probabilities"] > 0.5).astype(jnp.int32))

    # ---- Larger ragged batch, default bf16 compute: multi-tile grid ----
    B2 = 1050
    head2 = jax.random.normal(kh2, (B2, entity_dim), jnp.float32)
    tail2 = jax.random.normal(kt2, (B2, entity_dim), jnp.float32)
    relation_ids2 = jax.random.randint(kr2, (B2,), 0, num_relations)

    out2 = link_prediction_forward(head2, tail2, relation_ids2, params,
                                   use_pallas=True)            # bf16 default
    jax.block_until_ready(out2["scores"])
    ref2 = _reference_scores(head2, tail2, relation_ids2, params,
                             compute_dtype=jnp.bfloat16)
    assert out2["scores"].shape == (B2,)
    assert jnp.allclose(out2["scores"], ref2, atol=1e-2, rtol=1e-2), \
        "score mismatch vs bf16 reference (large)"
    assert out2["probabilities"].shape == (B2,)
    assert out2["predictions"].dtype == jnp.int32

    print("KERNEL_OK")
</pallas_src>

<mosaic_0001>
module attributes {stable_mosaic.version = 11 : i64} {
  func.func @_link_pred_kernel(%arg0: i32, %arg1: memref<128x32xf32, #tpu.memory_space<vmem>>, %arg2: memref<128x32xf32, #tpu.memory_space<vmem>>, %arg3: memref<128x32xf32, #tpu.memory_space<vmem>>, %arg4: memref<32x64xf32, #tpu.memory_space<vmem>>, %arg5: memref<32x64xf32, #tpu.memory_space<vmem>>, %arg6: memref<32x64xf32, #tpu.memory_space<vmem>>, %arg7: memref<1x64xf32, #tpu.memory_space<vmem>>, %arg8: memref<1x64xf32, #tpu.memory_space<vmem>>, %arg9: memref<1x64xf32, #tpu.memory_space<vmem>>, %arg10: memref<1xf32, #tpu.memory_space<smem>>, %arg11: memref<1x128xf32, #tpu.memory_space<vmem>>, %arg12: memref<1x128xf32, #tpu.memory_space<vmem>>, %arg13: memref<1x128xi32, #tpu.memory_space<vmem>>) attributes {dimension_semantics = [#tpu.dimension_semantics<parallel>], iteration_bounds = array<i64: 1>, scalar_prefetch = 0 : i64, scratch_operands = 0 : i64, tpu.core_type = #tpu.core_type<tc>, window_params = [{transform_indices = @transform_0, window_bounds = array<i64: 128, 32>}, {transform_indices = @transform_1, window_bounds = array<i64: 128, 32>}, {transform_indices = @transform_2, window_bounds = array<i64: 128, 32>}, {pipeline_mode = #tpu.pipeline_mode<synchronous>, transform_indices = @transform_3, window_bounds = array<i64: 32, 64>}, {pipeline_mode = #tpu.pipeline_mode<synchronous>, transform_indices = @transform_4, window_bounds = array<i64: 32, 64>}, {pipeline_mode = #tpu.pipeline_mode<synchronous>, transform_indices = @transform_5, window_bounds = array<i64: 32, 64>}, {pipeline_mode = #tpu.pipeline_mode<synchronous>, transform_indices = @transform_6, window_bounds = array<i64: 1, 64>}, {pipeline_mode = #tpu.pipeline_mode<synchronous>, transform_indices = @transform_7, window_bounds = array<i64: 1, 64>}, {pipeline_mode = #tpu.pipeline_mode<synchronous>, transform_indices = @transform_8, window_bounds = array<i64: 1, 64>}, {transform_indices = @transform_9, window_bounds = array<i64: 1>}, {transform_indices = @transform_10, window_bounds = array<i64: 1, 128>}, {transform_indices = @transform_11, window_bounds = array<i64: 1, 128>}, {transform_indices = @transform_12, window_bounds = array<i64: 1, 128>}]} {
    %c0 = arith.constant 0 : index
    %c0_0 = arith.constant 0 : index
    %0 = vector.load %arg1[%c0, %c0_0] : memref<128x32xf32, #tpu.memory_space<vmem>>, vector<128x32xf32>
    %c0_1 = arith.constant 0 : index
    %c0_2 = arith.constant 0 : index
    %1 = vector.load %arg4[%c0_1, %c0_2] : memref<32x64xf32, #tpu.memory_space<vmem>>, vector<32x64xf32>
    %cst = arith.constant dense<0.000000e+00> : vector<128x64xf32>
    %2 = tpu.matmul %0, %1, %cst {dimension_numbers = #tpu.dot_dimension_numbers<[1], [0], [0], [1], [0, 0, 1, 1], [], []>} : vector<128x32xf32>, vector<32x64xf32>, vector<128x64xf32> -> vector<128x64xf32>
    %c0_3 = arith.constant 0 : index
    %c0_4 = arith.constant 0 : index
    %3 = vector.load %arg7[%c0_3, %c0_4] : memref<1x64xf32, #tpu.memory_space<vmem>>, vector<1x64xf32>
    %4 = vector.broadcast %3 : vector<1x64xf32> to vector<128x64xf32>
    %5 = arith.addf %2, %4 : vector<128x64xf32>
    %c0_5 = arith.constant 0 : index
    %c0_6 = arith.constant 0 : index
    %6 = vector.load %arg2[%c0_5, %c0_6] : memref<128x32xf32, #tpu.memory_space<vmem>>, vector<128x32xf32>
    %c0_7 = arith.constant 0 : index
    %c0_8 = arith.constant 0 : index
    %7 = vector.load %arg5[%c0_7, %c0_8] : memref<32x64xf32, #tpu.memory_space<vmem>>, vector<32x64xf32>
    %cst_9 = arith.constant dense<0.000000e+00> : vector<128x64xf32>
    %8 = tpu.matmul %6, %7, %cst_9 {dimension_numbers = #tpu.dot_dimension_numbers<[1], [0], [0], [1], [0, 0, 1, 1], [], []>} : vector<128x32xf32>, vector<32x64xf32>, vector<128x64xf32> -> vector<128x64xf32>
    %c0_10 = arith.constant 0 : index
    %c0_11 = arith.constant 0 : index
    %9 = vector.load %arg8[%c0_10, %c0_11] : memref<1x64xf32, #tpu.memory_space<vmem>>, vector<1x64xf32>
    %10 = vector.broadcast %9 : vector<1x64xf32> to vector<128x64xf32>
    %11 = arith.addf %8, %10 : vector<128x64xf32>
    %c0_12 = arith.constant 0 : index
    %c0_13 = arith.constant 0 : index
    %12 = vector.load %arg3[%c0_12, %c0_13] : memref<128x32xf32, #tpu.memory_space<vmem>>, vector<128x32xf32>
    %c0_14 = arith.constant 0 : index
    %c0_15 = arith.constant 0 : index
    %13 = vector.load %arg6[%c0_14, %c0_15] : memref<32x64xf32, #tpu.memory_space<vmem>>, vector<32x64xf32>
    %cst_16 = arith.constant dense<0.000000e+00> : vector<128x64xf32>
    %14 = tpu.matmul %12, %13, %cst_16 {dimension_numbers = #tpu.dot_dimension_numbers<[1], [0], [0], [1], [0, 0, 1, 1], [], []>} : vector<128x32xf32>, vector<32x64xf32>, vector<128x64xf32> -> vector<128x64xf32>
    %c0_17 = arith.constant 0 : index
    %c0_18 = arith.constant 0 : index
    %15 = vector.load %arg9[%c0_17, %c0_18] : memref<1x64xf32, #tpu.memory_space<vmem>>, vector<1x64xf32>
    %16 = vector.broadcast %15 : vector<1x64xf32> to vector<128x64xf32>
    %17 = arith.addf %14, %16 : vector<128x64xf32>
    %18 = arith.mulf %5, %17 : vector<128x64xf32>
    %19 = arith.mulf %18, %11 : vector<128x64xf32>
    %cst_19 = arith.constant dense<0.000000e+00> : vector<128xf32>
    %20 = vector.multi_reduction <add>, %19, %cst_19 [1] : vector<128x64xf32> to vector<128xf32>
    %c0_20 = arith.constant 0 : index
    %21 = memref.load %arg10[%c0_20] : memref<1xf32, #tpu.memory_space<smem>>
    %22 = vector.broadcast %21 : f32 to vector<128xf32>
    %23 = arith.addf %20, %22 : vector<128xf32>
    %24 = vector.shape_cast %23 : vector<128xf32> to vector<1x128xf32>
    %25 = arith.negf %24 : vector<1x128xf32>
    %26 = math.exp %25 : vector<1x128xf32>
    %cst_21 = arith.constant 1.000000e+00 : f32
    %27 = vector.broadcast %cst_21 : f32 to vector<1x128xf32>
    %28 = arith.addf %27, %26 : vector<1x128xf32>
    %29 = arith.divf %27, %28 : vector<1x128xf32>
    %c0_22 = arith.constant 0 : index
    %c0_23 = arith.constant 0 : index
    %30 = vector.load %arg11[%c0_22, %c0_23] : memref<1x128xf32, #tpu.memory_space<vmem>>, vector<1x128xf32>
    tpu.vector_store %arg11[%c0_22, %c0_23], %24 {strides = array<i32>} : memref<1x128xf32, #tpu.memory_space<vmem>>, vector<1x128xf32>,
    %c0_24 = arith.constant 0 : index
    %c0_25 = arith.constant 0 : index
    %31 = vector.load %arg12[%c0_24, %c0_25] : memref<1x128xf32, #tpu.memory_space<vmem>>, vector<1x128xf32>
    tpu.vector_store %arg12[%c0_24, %c0_25], %29 {strides = array<i32>} : memref<1x128xf32, #tpu.memory_space<vmem>>, vector<1x128xf32>,
    %cst_26 = arith.constant 5.000000e-01 : f32
    %32 = vector.broadcast %cst_26 : f32 to vector<1x128xf32>
    %33 = arith.cmpf ogt, %29, %32 : vector<1x128xf32>
    %34 = arith.extui %33 : vector<1x128xi1> to vector<1x128xi32>
    %c0_27 = arith.constant 0 : index
    %c0_28 = arith.constant 0 : index
    %35 = vector.load %arg13[%c0_27, %c0_28] : memref<1x128xi32, #tpu.memory_space<vmem>>, vector<1x128xi32>
    tpu.vector_store %arg13[%c0_27, %c0_28], %34 {strides = array<i32>} : memref<1x128xi32, #tpu.memory_space<vmem>>, vector<1x128xi32>,
    return
  }
  func.func @transform_0(%arg0: i32) -> (i32, i32) {
    %c0_i32 = arith.constant 0 : i32
    %c0_i32_0 = arith.constant 0 : i32
    return %arg0, %c0_i32 : i32, i32
  }
  func.func @transform_1(%arg0: i32) -> (i32, i32) {
    %c0_i32 = arith.constant 0 : i32
    %c0_i32_0 = arith.constant 0 : i32
    return %arg0, %c0_i32 : i32, i32
  }
  func.func @transform_2(%arg0: i32) -> (i32, i32) {
    %c0_i32 = arith.constant 0 : i32
    %c0_i32_0 = arith.constant 0 : i32
    return %arg0, %c0_i32 : i32, i32
  }
  func.func @transform_3(%arg0: i32) -> (i32, i32) {
    %c0_i32 = arith.constant 0 : i32
    %c0_i32_0 = arith.constant 0 : i32
    %c0_i32_1 = arith.constant 0 : i32
    return %c0_i32, %c0_i32_0 : i32, i32
  }
  func.func @transform_4(%arg0: i32) -> (i32, i32) {
    %c0_i32 = arith.constant 0 : i32
    %c0_i32_0 = arith.constant 0 : i32
    %c0_i32_1 = arith.constant 0 : i32
    return %c0_i32, %c0_i32_0 : i32, i32
  }
  func.func @transform_5(%arg0: i32) -> (i32, i32) {
    %c0_i32 = arith.constant 0 : i32
    %c0_i32_0 = arith.constant 0 : i32
    %c0_i32_1 = arith.constant 0 : i32
    return %c0_i32, %c0_i32_0 : i32, i32
  }
  func.func @transform_6(%arg0: i32) -> (i32, i32) {
    %c0_i32 = arith.constant 0 : i32
    %c0_i32_0 = arith.constant 0 : i32
    %c0_i32_1 = arith.constant 0 : i32
    return %c0_i32, %c0_i32_0 : i32, i32
  }
  func.func @transform_7(%arg0: i32) -> (i32, i32) {
    %c0_i32 = arith.constant 0 : i32
    %c0_i32_0 = arith.constant 0 : i32
    %c0_i32_1 = arith.constant 0 : i32
    return %c0_i32, %c0_i32_0 : i32, i32
  }
  func.func @transform_8(%arg0: i32) -> (i32, i32) {
    %c0_i32 = arith.constant 0 : i32
    %c0_i32_0 = arith.constant 0 : i32
    %c0_i32_1 = arith.constant 0 : i32
    return %c0_i32, %c0_i32_0 : i32, i32
  }
  func.func @transform_9(%arg0: i32) -> i32 {
    %c0_i32 = arith.constant 0 : i32
    %c0_i32_0 = arith.constant 0 : i32
    return %c0_i32 : i32
  }
  func.func @transform_10(%arg0: i32) -> (i32, i32) {
    %c0_i32 = arith.constant 0 : i32
    %c0_i32_0 = arith.constant 0 : i32
    return %c0_i32, %arg0 : i32, i32
  }
  func.func @transform_11(%arg0: i32) -> (i32, i32) {
    %c0_i32 = arith.constant 0 : i32
    %c0_i32_0 = arith.constant 0 : i32
    return %c0_i32, %arg0 : i32, i32
  }
  func.func @transform_12(%arg0: i32) -> (i32, i32) {
    %c0_i32 = arith.constant 0 : i32
    %c0_i32_0 = arith.constant 0 : i32
    return %c0_i32, %arg0 : i32, i32
  }
}

</mosaic_0001>

<bundles_post_ra>
// kernel: tpu_custom_call.1
= control target key start
LH: loop header
LB: loop body
LE: loop exit
PB: predicated region body
PF: predicated region fallthrough
CT: control target
= control target key end

     0   :  { %19 = vsyncpa [#allocation4], 0  ;;  %vm68_vm0 = vcmask 261120   ;;  %s2366_s0 = inlined_call_operand.vmem [shape: f32[128,32], index: 0, kind: input, shape index: {}]   ;;  %s2367_s1 = inlined_call_operand.vmem [shape: f32[128,32], index: 1, kind: input, shape index: {}]   ;;  %s2368_s2 = inlined_call_operand.vmem [shape: f32[128,32], index: 2, kind: input, shape index: {}]   ;;  %s2369_s3 = inlined_call_operand.vmem [shape: f32[32,64], index: 3, kind: input, shape index: {}]   ;;  %s2370_s4 = inlined_call_operand.vmem [shape: f32[32,64], index: 4, kind: input, shape index: {}]   ;;  %s2371_s5 = inlined_call_operand.vmem [shape: f32[32,64], index: 5, kind: input, shape index: {}]   ;;  %s2372_s6 = inlined_call_operand.vmem [shape: f32[1,64], index: 6, kind: input, shape index: {}]   ;;  %s2373_s7 = inlined_call_operand.vmem [shape: f32[1,64], index: 7, kind: input, shape index: {}]   ;;  %s2374_s8 = inlined_call_operand.vmem [shape: f32[1,64], index: 8, kind: input, shape index: {}]   ;;  %s2375_s9 = inlined_call_operand.<no memory space> [shape: f32[1], index: 9, kind: input, shape index: {}]   ;;  %s2376_s10 = inlined_call_operand.hbm [shape: f32[1,128], index: 10, kind: output, shape index: {0}]   ;;  %s2377_s11 = inlined_call_operand.hbm [shape: f32[1,128], index: 11, kind: output, shape index: {1}]   ;;  %s2378_s12 = inlined_call_operand.hbm [shape: s32[1,128], index: 12, kind: output, shape index: {2}]  }
   0x1   :  { %v57_v0 = vld [vmem:[%s2369_s3] sm:$0xff]  ;;  %v58_v1 = vld [vmem:[%s2369_s3 + $0x8] sm:$0xff]  ;;  %v59_v2 = vld [vmem:[%s2369_s3 + $0x10] sm:$0xff] }
   0x2   :  { %v1499_v3 = vpack.c.bf16 %v58_v1, %v57_v0  ;;  %v60_v4 = vld [vmem:[%s2369_s3 + $0x18] sm:$0xff]  ;;  %v41_v5 = vld [vmem:[%s2366_s0] sm:$0xff]  ;;  %v499_v8 = vld [vmem:[%s2371_s5 + $0x8] sm:$0xff] }
   0x3   :  { %v1503_v6 = vpack.c.bf16 %v60_v4, %v59_v2  ;;  %1411 = vmatprep.mubr.msk.f32.mxu0 %vm68_vm0, %v41_v5  ;;  %v498_v7 = vld [vmem:[%s2371_s5] sm:$0xff]  ;;  %v279_v11 = vld [vmem:[%s2370_s4 + $0x8] sm:$0xff]  ;;  %v500_v14 = vld [vmem:[%s2371_s5 + $0x10] sm:$0xff] }
   0x4   :  { %1500 = vmatprep.subr.bf16.mxu0 %v1499_v3  ;;  %1523 = vmatprep.subr.bf16.mxu1 %v1499_v3  ;;  %v49_v9 = vld [vmem:[%s2366_s0 + $0x40] sm:$0xff]  ;;  %v1515_v12 = vpack.c.bf16 %v499_v8, %v498_v7  ;;  %v501_v15 = vld [vmem:[%s2371_s5 + $0x18] sm:$0xff]  ;;  %v280_v16 = vld [vmem:[%s2370_s4 + $0x10] sm:$0xff] }
   0x5   :  { %v278_v10 = vld [vmem:[%s2370_s4] sm:$0xff]  ;;  %1502 = vmatpush3.bf16.msra.mxu0 %v1499_v3  ;;  %1525 = vmatpush3.bf16.msra.mxu1 %v1499_v3  ;;  %v281_v17 = vld [vmem:[%s2370_s4 + $0x18] sm:$0xff]  ;;  %v42_v18 = vld [vmem:[%s2366_s0 + $0x8] sm:$0xff]  ;;  %v1519_v22 = vpack.c.bf16 %v501_v15, %v500_v14 }
   0x6   :  { %1504 = vmatprep.subr.bf16.mxu0 %v1503_v6  ;;  %1524 = vmatprep.subr.bf16.mxu1 %v1503_v6  ;;  %v1507_v13 = vpack.c.bf16 %v279_v11, %v278_v10  ;;  %v50_v19 = vld [vmem:[%s2366_s0 + $0x48] sm:$0xff]  ;;  %v43_v20 = vld [vmem:[%s2366_s0 + $0x10] sm:$0xff]  ;;  %v1511_v23 = vpack.c.bf16 %v281_v17, %v280_v16  ;;  %v44_v24 = vld [vmem:[%s2366_s0 + $0x18] sm:$0xff] }
   0x7   :  { %1423 = vmatprep.mubr.msk.f32.mxu1 %vm68_vm0, %v49_v9  ;;  %v51_v21 = vld [vmem:[%s2366_s0 + $0x50] sm:$0xff]  ;;  %v52_v25 = vld [vmem:[%s2366_s0 + $0x58] sm:$0xff]  ;;  %v45_v26 = vld [vmem:[%s2366_s0 + $0x20] sm:$0xff] }
   0x8   :  { %v53_v27 = vld [vmem:[%s2366_s0 + $0x60] sm:$0xff]  ;;  %v46_v28 = vld [vmem:[%s2366_s0 + $0x28] sm:$0xff]  ;;  %v47_v30 = vld [vmem:[%s2366_s0 + $0x30] sm:$0xff] }
   0x9   :  { %1506 = vmatpush3.bf16.msra.mxu0 %v1503_v6  ;;  %1526 = vmatpush3.bf16.msra.mxu1 %v1503_v6  ;;  %v54_v29 = vld [vmem:[%s2366_s0 + $0x68] sm:$0xff]  ;;  %v55_v31 = vld [vmem:[%s2366_s0 + $0x70] sm:$0xff]  ;;  %v48_v32 = vld [vmem:[%s2366_s0 + $0x38] sm:$0xff] }
   0xa   :  { %1516 = vmatprep.subr.bf16.mxu0 %v1515_v12  ;;  %1508 = vmatprep.subr.bf16.mxu1 %v1507_v13  ;;  %v56_v33 = vld [vmem:[%s2366_s0 + $0x78] sm:$0xff] }
   0xc   :  { %1412 = vmatmul.mubr.msk.f32.vlgmr.msra.gmra.mrb[0].mxu0 %vm68_vm0, %v42_v18  ;;  %1424 = vmatmul.mubr.msk.f32.vlgmr.msra.gmra.mrb[0].mxu1 %vm68_vm0, %v50_v19 }
   0xd   :  { %1518 = vmatpush3.bf16.msra.mxu0 %v1515_v12  ;;  %1414 = vmatprep.mubr.msk.f32.mxu0 %vm68_vm0, %v43_v20 }
   0xe   :  { %1510 = vmatpush3.bf16.msra.mxu1 %v1507_v13  ;;  %1426 = vmatprep.mubr.msk.f32.mxu1 %vm68_vm0, %v51_v21 }
   0xf   :  { %1520 = vmatprep.subr.bf16.mxu0 %v1519_v22  ;;  %1512 = vmatprep.subr.bf16.mxu1 %v1511_v23 }
  0x10   :  { %1415 = vmatmul.mubr.msk.f32.gmra.mrb[2].mxu0 %vm68_vm0, %v44_v24  ;;  %1427 = vmatmul.mubr.msk.f32.gmra.mrb[2].mxu1 %vm68_vm0, %v52_v25 }
  0x11   :  { %1417 = vmatprep.mubr.msk.f32.mxu0 %vm68_vm0, %v45_v26  ;;  %1429 = vmatprep.mubr.msk.f32.mxu1 %vm68_vm0, %v53_v27 }
  0x12   :  { %1522 = vmatpush3.bf16.msra.mxu0 %v1519_v22  ;;  %1514 = vmatpush3.bf16.msra.mxu1 %v1511_v23 }
  0x14   :  { %1418 = vmatmul.mubr.msk.f32.gmra.mrb[4].mxu0 %vm68_vm0, %v46_v28  ;;  %1430 = vmatmul.mubr.msk.f32.gmra.mrb[4].mxu1 %vm68_vm0, %v54_v29 }
  0x15   :  { %1420 = vmatprep.mubr.msk.f32.mxu0 %vm68_vm0, %v47_v30  ;;  %1432 = vmatprep.mubr.msk.f32.mxu1 %vm68_vm0, %v55_v31 }
  0x16   :  { %20 = vsyncpa [#allocation6], 0  ;;  %v482_v34 = vld [vmem:[%s2368_s2] sm:$0xff]  ;;  %v483_v36 = vld [vmem:[%s2368_s2 + $0x8] sm:$0xff]  ;;  %vm734_vm1 = vcmask 523264   ;;  %vm924_vm2 = vcmask 130112  }
  0x17   :  { %v262_v35 = vld [vmem:[%s2367_s1] sm:$0xff]  ;;  %v263_v37 = vld [vmem:[%s2367_s1 + $0x8] sm:$0xff]  ;;  %v484_v38 = vld [vmem:[%s2368_s2 + $0x10] sm:$0xff]  ;;  %vm931_vm3 = vcmask 195712   ;;  %vm938_vm4 = vcmask 261312   ;;  %vm945_vm5 = vcmask 326912  }
  0x18   :  { %1421 = vmatmul.mubr.msk.f32.gmra.mrb[6].mxu0 %vm68_vm0, %v48_v32  ;;  %1433 = vmatmul.mubr.msk.f32.gmra.mrb[6].mxu1 %vm68_vm0, %v56_v33  ;;  %v264_v39 = vld [vmem:[%s2367_s1 + $0x10] sm:$0xff]  ;;  %v485_v40 = vld [vmem:[%s2368_s2 + $0x18] sm:$0xff]  ;;  %v486_v42 = vld [vmem:[%s2368_s2 + $0x20] sm:$0xff]  ;;  %vm952_vm6 = vcmask 392512   ;;  %vm959_vm7 = vcmask 458112   ;;  %vm966_vm8 = vcmask 523712  }
  0x19   :  { %1475 = vmatprep.mubr.msk.f32.mxu0 %vm68_vm0, %v482_v34  ;;  %1443 = vmatprep.mubr.msk.f32.mxu1 %vm68_vm0, %v262_v35  ;;  %v265_v41 = vld [vmem:[%s2367_s1 + $0x18] sm:$0xff]  ;;  %v266_v43 = vld [vmem:[%s2367_s1 + $0x20] sm:$0xff]  ;;  %v487_v44 = vld [vmem:[%s2368_s2 + $0x28] sm:$0xff]  ;;  %vm973_vm9 = vcmask 589312   ;;  %vm2380_vm10 = vcmask 654912   ;;  %vm2379_vm11 = vcmask 720512  }
  0x1a   :  { %v267_v45 = vld [vmem:[%s2367_s1 + $0x28] sm:$0xff]  ;;  %v488_v46 = vld [vmem:[%s2368_s2 + $0x30] sm:$0xff]  ;;  %v489_v48 = vld [vmem:[%s2368_s2 + $0x38] sm:$0xff]  ;;  %vm994_vm13 = vcmask 786112   ;;  %vm1001_vm15 = vcmask 851712  }
  0x1b   :  { %v268_v47 = vld [vmem:[%s2367_s1 + $0x30] sm:$0xff]  ;;  %v269_v49 = vld [vmem:[%s2367_s1 + $0x38] sm:$0xff]  ;;  %v490_v50 = vld [vmem:[%s2368_s2 + $0x40] sm:$0xff] }
  0x1c   :  { %1476 = vmatmul.mubr.msk.f32.vlgmr.msra.gmra.mrb[8].mxu0 %vm68_vm0, %v483_v36  ;;  %1444 = vmatmul.mubr.msk.f32.vlgmr.msra.gmra.mrb[8].mxu1 %vm68_vm0, %v263_v37  ;;  %v270_v51 = vld [vmem:[%s2367_s1 + $0x40] sm:$0xff]  ;;  %v491_v52 = vld [vmem:[%s2368_s2 + $0x48] sm:$0xff]  ;;  %v492_v54 = vld [vmem:[%s2368_s2 + $0x50] sm:$0xff] }
  0x1d   :  { %1478 = vmatprep.mubr.msk.f32.mxu0 %vm68_vm0, %v484_v38  ;;  %1446 = vmatprep.mubr.msk.f32.mxu1 %vm68_vm0, %v264_v39  ;;  %v271_v53 = vld [vmem:[%s2367_s1 + $0x48] sm:$0xff]  ;;  %v272_v55 = vld [vmem:[%s2367_s1 + $0x50] sm:$0xff]  ;;  %v493_v56 = vld [vmem:[%s2368_s2 + $0x58] sm:$0xff] }
  0x1e   :  { %v273_v57 = vld [vmem:[%s2367_s1 + $0x58] sm:$0xff]  ;;  %v494_v58 = vld [vmem:[%s2368_s2 + $0x60] sm:$0xff]  ;;  %v495_v60 = vld [vmem:[%s2368_s2 + $0x68] sm:$0xff] }
  0x1f   :  { %v274_v59 = vld [vmem:[%s2367_s1 + $0x60] sm:$0xff]  ;;  %v275_v61 = vld [vmem:[%s2367_s1 + $0x68] sm:$0xff]  ;;  %v496_v62 = vld [vmem:[%s2368_s2 + $0x70] sm:$0xff] }
  0x20   :  { %1479 = vmatmul.mubr.msk.f32.gmra.mrb[10].mxu0 %vm68_vm0, %v485_v40  ;;  %1447 = vmatmul.mubr.msk.f32.gmra.mrb[10].mxu1 %vm68_vm0, %v265_v41  ;;  %v276_v63 = vld [vmem:[%s2367_s1 + $0x70] sm:$0xff]  ;;  %v497_v0 = vld [vmem:[%s2368_s2 + $0x78] sm:$0xff]  ;;  %v1981_v18 = vld [vmem:[%s2372_s6] ss:$0 sm:$0xff] }
  0x21   :  { %1481 = vmatprep.mubr.msk.f32.mxu0 %vm68_vm0, %v486_v42  ;;  %1449 = vmatprep.mubr.msk.f32.mxu1 %vm68_vm0, %v266_v43  ;;  %v277_v1 = vld [vmem:[%s2367_s1 + $0x78] sm:$0xff]  ;;  %v1986_v19 = vld [vmem:[%s2374_s8] ss:$0 sm:$0xff]  ;;  %s1666_s8 = smov [#allocation3]  }
  0x22   :  { %v1991_v20 = vld [vmem:[%s2373_s7] ss:$0 sm:$0xff] }
  0x24   :  { %1482 = vmatmul.mubr.msk.f32.gmra.mrb[12].mxu0 %vm68_vm0, %v487_v44  ;;  %1450 = vmatmul.mubr.msk.f32.gmra.mrb[12].mxu1 %vm68_vm0, %v267_v45 }
  0x25   :  { %1484 = vmatprep.mubr.msk.f32.mxu0 %vm68_vm0, %v488_v46  ;;  %1452 = vmatprep.mubr.msk.f32.mxu1 %vm68_vm0, %v268_v47 }
  0x28   :  { %1485 = vmatmul.mubr.msk.f32.gmra.mrb[14].mxu0 %vm68_vm0, %v489_v48  ;;  %1453 = vmatmul.mubr.msk.f32.gmra.mrb[14].mxu1 %vm68_vm0, %v269_v49 }
  0x29   :  { %1487 = vmatprep.mubr.msk.f32.mxu0 %vm68_vm0, %v490_v50  ;;  %1455 = vmatprep.mubr.msk.f32.mxu1 %vm68_vm0, %v270_v51 }
  0x2c   :  { %1488 = vmatmul.mubr.msk.f32.gmra.mrb[16].mxu0 %vm68_vm0, %v491_v52  ;;  %1456 = vmatmul.mubr.msk.f32.gmra.mrb[16].mxu1 %vm68_vm0, %v271_v53 }
  0x2d   :  { %1490 = vmatprep.mubr.msk.f32.mxu0 %vm68_vm0, %v492_v54  ;;  %1458 = vmatprep.mubr.msk.f32.mxu1 %vm68_vm0, %v272_v55 }
  0x30   :  { %1491 = vmatmul.mubr.msk.f32.gmra.mrb[18].mxu0 %vm68_vm0, %v493_v56  ;;  %1459 = vmatmul.mubr.msk.f32.gmra.mrb[18].mxu1 %vm68_vm0, %v273_v57 }
  0x31   :  { %1493 = vmatprep.mubr.msk.f32.mxu0 %vm68_vm0, %v494_v58  ;;  %1461 = vmatprep.mubr.msk.f32.mxu1 %vm68_vm0, %v274_v59 }
  0x34   :  { %1494 = vmatmul.mubr.msk.f32.gmra.mrb[20].mxu0 %vm68_vm0, %v495_v60  ;;  %1462 = vmatmul.mubr.msk.f32.gmra.mrb[20].mxu1 %vm68_vm0, %v275_v61 }
  0x35   :  { %1496 = vmatprep.mubr.msk.f32.mxu0 %vm68_vm0, %v496_v62  ;;  %1464 = vmatprep.mubr.msk.f32.mxu1 %vm68_vm0, %v276_v63 }
  0x38   :  { %1497 = vmatmul.mubr.msk.f32.gmra.mrb[22].mxu0 %vm68_vm0, %v497_v0  ;;  %1465 = vmatmul.mubr.msk.f32.gmra.mrb[22].mxu1 %vm68_vm0, %v277_v1  ;;  %vm1008_vm0 = vcmask 917312  }
  0xdf   :  { %v1413_v2 = vpop.f32.mrb[0].mxu0  ;;  %v1962_v3 = vpop.f32.mrb[0].mxu1 }
  0xe0   :  { %v183_v4 = vpop.f32.mrb[1].mxu0  ;;  %v1964_v5 = vpop.f32.mrb[1].mxu1  ;;  %v189_v23 = vadd.f32 %v1413_v2, %v1981_v18 }
  0xe1   :  { %v184_v28 = vadd.f32 %v1981_v18, %v183_v4 }
  0xe3   :  { %v1416_v6 = vpop.f32.mrb[2].mxu0  ;;  %v1966_v7 = vpop.f32.mrb[2].mxu1 }
  0xe4   :  { %v193_v8 = vpop.f32.mrb[3].mxu0  ;;  %v1968_v9 = vpop.f32.mrb[3].mxu1  ;;  %v199_v35 = vadd.f32 %v1416_v6, %v1981_v18 }
  0xe5   :  { %v194_v41 = vadd.f32 %v1981_v18, %v193_v8 }
  0xe7   :  { %v1419_v10 = vpop.f32.mrb[4].mxu0  ;;  %v1970_v11 = vpop.f32.mrb[4].mxu1 }
  0xe8   :  { %v203_v12 = vpop.f32.mrb[5].mxu0  ;;  %v1972_v13 = vpop.f32.mrb[5].mxu1  ;;  %v209_v50 = vadd.f32 %v1419_v10, %v1981_v18 }
  0xe9   :  { %v204_v56 = vadd.f32 %v1981_v18, %v203_v12 }
  0xeb   :  { %v1422_v14 = vpop.f32.mrb[6].mxu0  ;;  %v1974_v15 = vpop.f32.mrb[6].mxu1 }
  0xec   :  { %v213_v16 = vpop.f32.mrb[7].mxu0  ;;  %v1976_v17 = vpop.f32.mrb[7].mxu1  ;;  %v219_v2 = vadd.f32 %v1422_v14, %v1981_v18 }
  0xef   :  { %v1477_v21 = vpop.f32.mrb[8].mxu0  ;;  %v1445_v22 = vpop.f32.mrb[8].mxu1 }
  0xf0   :  { %v629_v24 = vadd.f32 %v1477_v21, %v1986_v19  ;;  %v623_v25 = vpop.f32.mrb[9].mxu0  ;;  %v409_v26 = vadd.f32 %v1445_v22, %v1991_v20  ;;  %v403_v27 = vpop.f32.mrb[9].mxu1  ;;  %v214_v21 = vadd.f32 %v1981_v18, %v213_v16 }
  0xf1   :  { %v624_v29 = vadd.f32 %v1986_v19, %v623_v25  ;;  %v404_v30 = vadd.f32 %v1991_v20, %v403_v27 }
  0xf2   :  { %v703_v31 = vmul.f32 %v629_v24, %v189_v23 }
  0xf3   :  { %v702_v32 = vmul.f32 %v624_v29, %v184_v28  ;;  %v1480_v33 = vpop.f32.mrb[10].mxu0  ;;  %v1448_v34 = vpop.f32.mrb[10].mxu1 }
  0xf4   :  { %v639_v36 = vadd.f32 %v1480_v33, %v1986_v19  ;;  %v633_v37 = vpop.f32.mrb[11].mxu0  ;;  %v419_v38 = vadd.f32 %v1448_v34, %v1991_v20  ;;  %v413_v39 = vpop.f32.mrb[11].mxu1  ;;  %v719_v40 = vmul.f32 %v703_v31, %v409_v26 }
  0xf5   :  { %v634_v42 = vadd.f32 %v1986_v19, %v633_v37  ;;  %v414_v43 = vadd.f32 %v1991_v20, %v413_v39  ;;  %v718_v44 = vmul.f32 %v702_v32, %v404_v30  ;;  %v229_v30 = vadd.f32 %v1962_v3, %v1981_v18 }
  0xf6   :  { %v705_v45 = vmul.f32 %v639_v36, %v199_v35  ;;  %v738_v46 = vsel %vm734_vm1, %v719_v40, 0.0  ;;  %v224_v35 = vadd.f32 %v1981_v18, %v1964_v5 }
  0xf7   :  { %v704_v47 = vmul.f32 %v634_v42, %v194_v41  ;;  %739 = vadd.xlane.f32.xlu0 %v738_v46  ;;  %v1483_v48 = vpop.f32.mrb[12].mxu0  ;;  %v1451_v49 = vpop.f32.mrb[12].mxu1  ;;  %v735_v62 = vsel %vm734_vm1, %v718_v44, 0.0  ;;  %v239_v44 = vadd.f32 %v1966_v7, %v1981_v18 }
  0xf8   :  { %v649_v51 = vadd.f32 %v1483_v48, %v1986_v19  ;;  %v643_v52 = vpop.f32.mrb[13].mxu0  ;;  %v429_v53 = vadd.f32 %v1451_v49, %v1991_v20  ;;  %v423_v54 = vpop.f32.mrb[13].mxu1  ;;  %v721_v55 = vmul.f32 %v705_v45, %v419_v38  ;;  %v234_v49 = vadd.f32 %v1981_v18, %v1968_v9 }
  0xf9   :  { %v644_v57 = vadd.f32 %v1986_v19, %v643_v52  ;;  %v424_v58 = vadd.f32 %v1991_v20, %v423_v54  ;;  %v720_v59 = vmul.f32 %v704_v47, %v414_v43 }
  0xfa   :  { %v707_v60 = vmul.f32 %v649_v51, %v209_v50  ;;  %v744_v61 = vsel %vm734_vm1, %v721_v55, 0.0 }
  0xfb   :  { %v706_v63 = vmul.f32 %v644_v57, %v204_v56  ;;  %745 = vadd.xlane.f32.xlu1 %v744_v61  ;;  %v1486_v0 = vpop.f32.mrb[14].mxu0  ;;  %736 = vadd.xlane.f32.xlu0 %v735_v62  ;;  %v1454_v1 = vpop.f32.mrb[14].mxu1  ;;  %v741_v26 = vsel %vm734_vm1, %v720_v59, 0.0 }
  0xfc   :  { %v659_v4 = vadd.f32 %v1486_v0, %v1986_v19  ;;  %v653_v6 = vpop.f32.mrb[15].mxu0  ;;  %v439_v8 = vadd.f32 %v1454_v1, %v1991_v20  ;;  %v433_v10 = vpop.f32.mrb[15].mxu1  ;;  %v723_v12 = vmul.f32 %v707_v60, %v429_v53 }
  0xfd   :  { %v654_v22 = vadd.f32 %v1986_v19, %v653_v6  ;;  %v434_v23 = vadd.f32 %v1991_v20, %v433_v10  ;;  %v722_v24 = vmul.f32 %v706_v63, %v424_v58  ;;  %v249_v58 = vadd.f32 %v1970_v11, %v1981_v18 }
  0xfe   :  { %v709_v25 = vmul.f32 %v659_v4, %v219_v2  ;;  %v750_v40 = vsel %vm734_vm1, %v723_v12, 0.0  ;;  %v244_v63 = vadd.f32 %v1981_v18, %v1972_v13 }
  0xff   :  { %v708_v27 = vmul.f32 %v654_v22, %v214_v21  ;;  %v1489_v28 = vpop.f32.mrb[16].mxu0  ;;  %742 = vadd.xlane.f32.xlu1 %v741_v26  ;;  %v747_v14 = vsel %vm734_vm1, %v722_v24, 0.0  ;;  %v1457_v29 = vpop.f32.mrb[16].mxu1  ;;  %v259_v21 = vadd.f32 %v1974_v15, %v1981_v18  ;;  %v254_v26 = vadd.f32 %v1981_v18, %v1976_v17 }
 0x100   :  { %v669_v31 = vadd.f32 %v1489_v28, %v1986_v19  ;;  %v663_v16 = vpop.f32.mrb[17].mxu0  ;;  %748 = vadd.xlane.f32.xlu0 %v747_v14  ;;  %v449_v32 = vadd.f32 %v1457_v29, %v1991_v20  ;;  %v443_v33 = vpop.f32.mrb[17].mxu1  ;;  %v725_v34 = vmul.f32 %v709_v25, %v439_v8 }
 0x101   :  { %v664_v36 = vadd.f32 %v1986_v19, %v663_v16  ;;  %v444_v37 = vadd.f32 %v1991_v20, %v443_v33  ;;  %v724_v38 = vmul.f32 %v708_v27, %v434_v23 }
 0x102   :  { %v711_v39 = vmul.f32 %v669_v31, %v229_v30  ;;  %v756_v54 = vsel %vm734_vm1, %v725_v34, 0.0 }
 0x103   :  { %v710_v3 = vmul.f32 %v664_v36, %v224_v35  ;;  %v1492_v41 = vpop.f32.mrb[18].mxu0  ;;  %751 = vadd.xlane.f32.xlu1 %v750_v40  ;;  %v753_v42 = vsel %vm734_vm1, %v724_v38, 0.0  ;;  %v1460_v43 = vpop.f32.mrb[18].mxu1 }
 0x104   :  { %v679_v45 = vadd.f32 %v1492_v41, %v1986_v19  ;;  %v673_v5 = vpop.f32.mrb[19].mxu0  ;;  %754 = vadd.xlane.f32.xlu0 %v753_v42  ;;  %v459_v46 = vadd.f32 %v1460_v43, %v1991_v20  ;;  %v453_v47 = vpop.f32.mrb[19].mxu1  ;;  %v727_v48 = vmul.f32 %v711_v39, %v449_v32 }
 0x105   :  { %v674_v50 = vadd.f32 %v1986_v19, %v673_v5  ;;  %v454_v51 = vadd.f32 %v1991_v20, %v453_v47  ;;  %v726_v52 = vmul.f32 %v710_v3, %v444_v37 }
 0x106   :  { %v713_v53 = vmul.f32 %v679_v45, %v239_v44  ;;  %v762_v6 = vsel %vm734_vm1, %v727_v48, 0.0 }
 0x107   :  { %v712_v7 = vmul.f32 %v674_v50, %v234_v49  ;;  %v1495_v55 = vpop.f32.mrb[20].mxu0  ;;  %757 = vadd.xlane.f32.xlu1 %v756_v54  ;;  %v759_v56 = vsel %vm734_vm1, %v726_v52, 0.0  ;;  %v1463_v57 = vpop.f32.mrb[20].mxu1 }
 0x108   :  { %v689_v59 = vadd.f32 %v1495_v55, %v1986_v19  ;;  %v683_v9 = vpop.f32.mrb[21].mxu0  ;;  %760 = vadd.xlane.f32.xlu0 %v759_v56  ;;  %v469_v60 = vadd.f32 %v1463_v57, %v1991_v20  ;;  %v463_v61 = vpop.f32.mrb[21].mxu1  ;;  %v729_v62 = vmul.f32 %v713_v53, %v459_v46 }
 0x109   :  { %v684_v0 = vadd.f32 %v1986_v19, %v683_v9  ;;  %v464_v1 = vadd.f32 %v1991_v20, %v463_v61  ;;  %v728_v2 = vmul.f32 %v712_v7, %v454_v51 }
 0x10a   :  { %v715_v4 = vmul.f32 %v689_v59, %v249_v58  ;;  %v768_v30 = vsel %vm734_vm1, %v729_v62, 0.0 }
 0x10b   :  { %v714_v11 = vmul.f32 %v684_v0, %v244_v63  ;;  %v1498_v8 = vpop.f32.mrb[22].mxu0  ;;  %763 = vadd.xlane.f32.xlu1 %v762_v6  ;;  %v765_v10 = vsel %vm734_vm1, %v728_v2, 0.0  ;;  %v1466_v12 = vpop.f32.mrb[22].mxu1 }
 0x10c   :  { %v699_v22 = vadd.f32 %v1498_v8, %v1986_v19  ;;  %v693_v13 = vpop.f32.mrb[23].mxu0  ;;  %766 = vadd.xlane.f32.xlu0 %v765_v10  ;;  %v479_v23 = vadd.f32 %v1466_v12, %v1991_v20  ;;  %v473_v24 = vpop.f32.mrb[23].mxu1  ;;  %v731_v25 = vmul.f32 %v715_v4, %v469_v60 }
 0x10d   :  { %v694_v27 = vadd.f32 %v1986_v19, %v693_v13  ;;  %v474_v28 = vadd.f32 %v1991_v20, %v473_v24  ;;  %v730_v14 = vmul.f32 %v714_v11, %v464_v1  ;;  %v2068_v19 = vstv %s2375_s9  ;;  %s1241_s9 = sshll.u32 %s1666_s8, 4  ;;  %s1242_s9 = int_to_ptr.vmem [resolvable:$true] %s1241_s9 }
 0x10e   :  { %v717_v29 = vmul.f32 %v699_v22, %v259_v21  ;;  %v774_v33 = vsel %vm734_vm1, %v731_v25, 0.0  ;;  %v913_v20 = vlaneseq  ;;  %s1595_s3 = scalar_lea.vmem %s1242_s9, 16  ;;  %s1599_s19 = scalar_lea.vmem %s1242_s9, 32 }
 0x10f   :  { %v716_v15 = vmul.f32 %v694_v27, %v254_v26  ;;  %769 = vadd.xlane.f32.xlu1 %v768_v30  ;;  %v771_v31 = vsel %vm734_vm1, %v730_v14, 0.0  ;;  %p1596_p0 = scmp.ne.s32.totalorder %s1242_s9, %s1595_s3  ;;  %p1600_p1 = scmp.lt.s32.totalorder %s1242_s9, %s1242_s9 }
 0x110   :  { %772 = vadd.xlane.f32.xlu0 %v771_v31  ;;  %v733_v16 = vmul.f32 %v717_v29, %v479_v23  ;;  %v2071_v36 = vand.u32 127, %v913_v20  ;;  %v2076_v42 = vshrl.u32 %v913_v20, 7  ;;  %p1601_p2 = scmp.lt.s32.totalorder %s1599_s19, %s1595_s3 }
 0x111   :  { %v732_v32 = vmul.f32 %v716_v15, %v474_v28 }
 0x112   :  { %v780_v18 = vsel %vm734_vm1, %v733_v16, 0.0  ;;  %v926_v41 = vadd.s32 4294967280, %v2071_v36  ;;  %v919_v43 = vadd.s32 4294967288, %v2071_v36  ;;  %v933_v5 = vadd.s32 4294967272, %v2071_v36  ;;  %p1602_p3 = por %p1601_p2, %p1600_p1 }
 0x113   :  { %775 = vadd.xlane.f32.xlu1 %v774_v33  ;;  %v777_v17 = vsel %vm734_vm1, %v732_v32, 0.0  ;;  %v2082_v46 = vsub.s32 %v2071_v36, %v2076_v42  ;;  %v940_v50 = vadd.s32 4294967264, %v2071_v36  ;;  %v947_v7 = vadd.s32 4294967256, %v2071_v36 }
 0x114   :  { %778 = vadd.xlane.f32.xlu0 %v777_v17  ;;  %v2085_v48 = vsub.s32 %v926_v41, %v2076_v42  ;;  %v2090_v52 = vsub.s32 %v919_v43, %v2076_v42  ;;  %v2095_v55 = vsub.s32 %v933_v5, %v2076_v42  ;;  %v954_v63 = vadd.s32 4294967248, %v2071_v36  ;;  %p1603_p4 = pnand %p1602_p3, %p1596_p0 }
 0x115   :  { %v2100_v9 = vsub.s32 %v940_v50, %v2076_v42  ;;  %v2111_v2 = vsub.s32 %v947_v7, %v2076_v42  ;;  %v961_v8 = vadd.s32 4294967240, %v2071_v36  ;;  %v968_v25 = vadd.s32 4294967232, %v2071_v36 }
 0x116   :  { %v2123_v24 = vsub.s32 %v954_v63, %v2076_v42  ;;  %v975_v15 = vadd.s32 4294967224, %v2071_v36 }
 0x117   :  { %781 = vadd.xlane.f32.xlu1 %v780_v18  ;;  %v2133_v30 = vsub.s32 %v961_v8, %v2076_v42 }
 0x118   :  { %v2152_v43 = vsub.s32 %v975_v15, %v2076_v42 }
 0x184   :  { %v740_v34 = vpop.xlane.xlu0 %739 }
 0x185   :  { %v786_v35 = vadd.f32 %v2068_v19, %v740_v34  ;;  %v2143_v34 = vsub.s32 %v968_v25, %v2076_v42  ;;  %v1017_v25 = vadd.s32 4294967176, %v2071_v36 }
 0x187   :  { %v1328_v37 = vmul.f32 -1.442695, %v786_v35  ;;  %v923_v62 = vrot.slane %v786_v35, %v2090_v52 }
 0x188   :  { %v746_v38 = vpop.xlane.xlu1 %745  ;;  %v737_v39 = vpop.xlane.xlu0 %736 }
 0x189   :  { %1531 = vpow2.f32 %v1328_v37  ;;  %v788_v40 = vadd.f32 %v2068_v19, %v746_v38  ;;  %v785_v3 = vadd.f32 %v2068_v19, %v737_v39 }
 0x18b   :  { %v1330_v44 = vmul.f32 -1.442695, %v788_v40  ;;  %v1327_v45 = vmul.f32 -1.442695, %v785_v3  ;;  %v918_v56 = vrot.slane %v785_v3, %v2082_v46  ;;  %v937_v23 = vrot.slane %v788_v40, %v2095_v55 }
 0x18c   :  { %v743_v47 = vpop.xlane.xlu1 %742  ;;  %v982_v40 = vadd.s32 4294967216, %v2071_v36 }
 0x18d   :  { %v787_v49 = vadd.f32 %v2068_v19, %v743_v47  ;;  %v749_v51 = vpop.xlane.xlu0 %748  ;;  %1533 = vpow2.f32 %v1327_v45  ;;  %v925_v11 = vsel %vm924_vm2, %v923_v62, %v918_v56 }
 0x18e   :  { %v789_v53 = vadd.f32 %v2068_v19, %v749_v51  ;;  %1535 = vpow2.f32 %v1330_v44  ;;  %v989_v44 = vadd.s32 4294967208, %v2071_v36 }
 0x18f   :  { %v1329_v54 = vmul.f32 -1.442695, %v787_v49  ;;  %v930_v59 = vrot.slane %v787_v49, %v2085_v48 }
 0x190   :  { %v1331_v57 = vmul.f32 -1.442695, %v789_v53  ;;  %v752_v58 = vpop.xlane.xlu1 %751  ;;  %v944_v27 = vrot.slane %v789_v53, %v2100_v9  ;;  %v2182_v8 = vsub.s32 %v989_v44, %v2076_v42 }
 0x191   :  { %1537 = vpow2.f32 %v1329_v54  ;;  %v2103_v60 = vadd.f32 %v2068_v19, %v752_v58  ;;  %v755_v61 = vpop.xlane.xlu0 %754  ;;  %v932_v12 = vsel %vm931_vm3, %v930_v59, %v925_v11  ;;  %v996_v58 = vadd.s32 4294967200, %v2071_v36 }
 0x192   :  { %v2108_v0 = vadd.f32 %v2068_v19, %v755_v61  ;;  %1539 = vpow2.f32 %v1331_v57  ;;  %v939_v29 = vsel %vm938_vm4, %v937_v23, %v932_v12  ;;  %v1010_v23 = vadd.s32 4294967184, %v2071_v36 }
 0x193   :  { %v1532_v1 = vpop.eup %1531  ;;  %v1332_v4 = vmul.f32 -1.442695, %v2103_v60  ;;  %v951_v20 = vrot.slane %v2103_v60, %v2111_v2  ;;  %v946_v38 = vsel %vm945_vm5, %v944_v27, %v939_v29  ;;  %v2170_v60 = vsub.s32 %v982_v40, %v2076_v42 }
 0x194   :  { %v850_v6 = vadd.f32 1.0, %v1532_v1  ;;  %v758_v10 = vpop.xlane.xlu1 %757  ;;  %v1333_v21 = vmul.f32 -1.442695, %v2108_v0  ;;  %v958_v47 = vrot.slane %v2108_v0, %v2123_v24  ;;  %v2185_v12 = vsub.s32 %v996_v58, %v2076_v42 }
 0x195   :  { %1541 = vpow2.f32 %v1332_v4  ;;  %v2119_v22 = vadd.f32 %v2068_v19, %v758_v10  ;;  %v761_v13 = vpop.xlane.xlu0 %760  ;;  %v953_v53 = vsel %vm952_vm6, %v951_v20, %v946_v38  ;;  %v2214_v38 = vsub.s32 %v1017_v25, %v2076_v42 }
 0x196   :  { %v2127_v26 = vadd.f32 %v2068_v19, %v761_v13  ;;  %1543 = vrcp.f32 %v850_v6  ;;  %v960_v62 = vsel %vm959_vm7, %v958_v47, %v953_v53  ;;  %v1003_v13 = vadd.s32 4294967192, %v2071_v36 }
 0x197   :  { %v1334_v28 = vmul.f32 -1.442695, %v2119_v22  ;;  %v1534_v14 = vpop.eup %1533  ;;  %1545 = vpow2.f32 %v1333_v21  ;;  %v965_v54 = vrot.slane %v2119_v22, %v2133_v30  ;;  %v1665_v40 = vmov 0  }
 0x198   :  { %v764_v31 = vpop.xlane.xlu1 %763  ;;  %v1536_v16 = vpop.eup %1535  ;;  %v849_v32 = vadd.f32 1.0, %v1534_v14  ;;  %v1335_v33 = vmul.f32 -1.442695, %v2127_v26  ;;  %v972_v63 = vrot.slane %v2127_v26, %v2143_v34 }
 0x199   :  { %v2138_v17 = vadd.f32 %v2068_v19, %v764_v31  ;;  %v767_v18 = vpop.xlane.xlu0 %766  ;;  %1547 = vpow2.f32 %v1334_v28  ;;  %v852_v3 = vadd.f32 1.0, %v1536_v16  ;;  %v967_v6 = vsel %vm966_vm8, %v965_v54, %v960_v62 }
 0x19a   :  { %v2146_v35 = vadd.f32 %v2068_v19, %v767_v18  ;;  %1549 = vrcp.f32 %v849_v32  ;;  %v974_v27 = vsel %vm973_vm9, %v972_v63, %v967_v6 }
 0x19b   :  { %v1538_v37 = vpop.eup %1537  ;;  %v1336_v39 = vmul.f32 -1.442695, %v2138_v17  ;;  %1551 = vpow2.f32 %v1335_v33  ;;  %v979_v11 = vrot.slane %v2138_v17, %v2152_v43  ;;  %v2205_v17 = vsub.s32 %v1003_v13, %v2076_v42 }
 0x19c   :  { %v851_v41 = vadd.f32 1.0, %v1538_v37  ;;  %v770_v45 = vpop.xlane.xlu1 %769  ;;  %v1540_v5 = vpop.eup %1539  ;;  %v1337_v49 = vmul.f32 -1.442695, %v2146_v35  ;;  %v986_v28 = vrot.slane %v2146_v35, %v2170_v60  ;;  %v2211_v37 = vsub.s32 %v1010_v23, %v2076_v42 }
 0x19d   :  { %v2159_v50 = vadd.f32 %v2068_v19, %v770_v45  ;;  %v773_v51 = vpop.xlane.xlu0 %772  ;;  %v853_v59 = vadd.f32 1.0, %v1540_v5  ;;  %v981_v29 = vsel %vm2380_vm10, %v979_v11, %v974_v27  ;;  %vm1022_vm10 = vcmask 1048512  }
 0x19e   :  { %1553 = vrcp.f32 %v851_v41  ;;  %v2165_v7 = vadd.f32 %v2068_v19, %v773_v51  ;;  %v988_v20 = vsel %vm2379_vm11, %v986_v28, %v981_v29  ;;  %vm1015_vm11 = vcmask 982912  }
 0x19f   :  { %v1542_v56 = vpop.eup %1541  ;;  %1555 = vpow2.f32 %v1336_v39  ;;  %v1338_v57 = vmul.f32 -1.442695, %v2159_v50  ;;  %v993_v15 = vrot.slane %v2159_v50, %v2182_v8 }
 0x1a0   :  { %1557 = vrcp.f32 %v852_v3  ;;  %v776_v61 = vpop.xlane.xlu1 %775  ;;  %v1339_v0 = vmul.f32 -1.442695, %v2165_v7  ;;  %v2176_v1 = vpop.eup %1543  ;;  %v854_v4 = vadd.f32 1.0, %v1542_v56  ;;  %v1000_v35 = vrot.slane %v2165_v7, %v2185_v12 }
 0x1a1   :  { %1559 = vpow2.f32 %v1337_v49  ;;  %v1546_v10 = vpop.eup %1545  ;;  %v2188_v21 = vadd.f32 %v2068_v19, %v776_v61  ;;  %vm1124_vm12 = vcmp.gt.f32.partialorder %v2176_v1, 0.5  ;;  %v779_v16 = vpop.xlane.xlu0 %778  ;;  %v995_v41 = vsel %vm994_vm13, %v993_v15, %v988_v20 }
 0x1a2   :  { %1561 = vpow2.f32 %v1338_v57  ;;  %v855_v36 = vadd.f32 1.0, %v1546_v10  ;;  %v1140_v3 = vsel %vm1124_vm12, 1, %v1665_v40  ;;  %v799_v44 = vadd.f32 %v2068_v19, %v779_v16 }
 0x1a3   :  { %v1548_v22 = vpop.eup %1547  ;;  %1563 = vrcp.f32 %v853_v59  ;;  %v1340_v14 = vmul.f32 -1.442695, %v2188_v21  ;;  %v1049_v50 = vrot.slane %v2176_v1, %v2090_v52  ;;  %v1162_v51 = vrot.slane %v1140_v3, %v2090_v52 }
 0x1a4   :  { %v2193_v26 = vpop.eup %1549  ;;  %1565 = vpow2.f32 %v1339_v0  ;;  %v856_v33 = vadd.f32 1.0, %v1548_v22  ;;  %v1002_v54 = vsel %vm1001_vm15, %v1000_v35, %v995_v41  ;;  %v782_v7 = vpop.xlane.xlu1 %781  ;;  %v1007_v52 = vrot.slane %v2188_v21, %v2205_v17 }
 0x1a5   :  { %1567 = vrcp.f32 %v854_v4  ;;  %v1552_v31 = vpop.eup %1551  ;;  %vm1123_vm14 = vcmp.gt.f32.partialorder %v2193_v26, 0.5  ;;  %v1045_v53 = vrot.slane %v2193_v26, %v2082_v46  ;;  %v1341_v63 = vmul.f32 -1.442695, %v799_v44 }
 0x1a6   :  { %1569 = vpow2.f32 %v1340_v14  ;;  %v1139_v5 = vsel %vm1123_vm14, 1, %v1665_v40  ;;  %v857_v42 = vadd.f32 1.0, %v1552_v31  ;;  %v1014_v23 = vrot.slane %v799_v44, %v2211_v37 }
 0x1a7   :  { %1571 = vrcp.f32 %v855_v36  ;;  %v1158_v57 = vrot.slane %v1139_v5, %v2082_v46  ;;  %v800_v46 = vadd.f32 %v2068_v19, %v782_v7  ;;  %v1050_v10 = vsel %vm924_vm2, %v1049_v50, %v1045_v53 }
 0x1a8   :  { %v1554_v32 = vpop.eup %1553  ;;  %1573 = vrcp.f32 %v856_v33  ;;  %v1009_v19 = vsel %vm1008_vm0, %v1007_v52, %v1002_v54 }
 0x1a9   :  { %v1556_v18 = vpop.eup %1555  ;;  %vm1125_vm1 = vcmp.gt.f32.partialorder %v1554_v32, 0.5  ;;  %v1054_v62 = vrot.slane %v1554_v32, %v2085_v48  ;;  %1575 = vrcp.f32 %v857_v42  ;;  %v1163_v21 = vsel %vm924_vm2, %v1162_v51, %v1158_v57 }
 0x1aa   :  { %v2216_v39 = vpop.eup %1557  ;;  %v858_v47 = vadd.f32 1.0, %v1556_v18  ;;  %v1141_v58 = vsel %vm1125_vm1, 1, %v1665_v40  ;;  %v1342_v26 = vmul.f32 -1.442695, %v800_v46  ;;  %v1021_v15 = vrot.slane %v800_v46, %v2214_v38 }
 0x1ab   :  { %v1560_v45 = vpop.eup %1559  ;;  %vm1126_vm12 = vcmp.gt.f32.partialorder %v2216_v39, 0.5  ;;  %v1059_v1 = vrot.slane %v2216_v39, %v2095_v55  ;;  %v1167_v22 = vrot.slane %v1141_v58, %v2085_v48  ;;  %v1055_v25 = vsel %vm931_vm3, %v1054_v62, %v1050_v10 }
 0x1ac   :  { %v1562_v49 = vpop.eup %1561  ;;  %v859_v59 = vadd.f32 1.0, %v1560_v45  ;;  %1577 = vrcp.f32 %v858_v47  ;;  %v1142_v11 = vsel %vm1126_vm12, 1, %v1665_v40  ;;  %v1016_v32 = vsel %vm1015_vm11, %v1014_v23, %v1009_v19 }
 0x1ad   :  { %v1564_v56 = vpop.eup %1563  ;;  %v860_v4 = vadd.f32 1.0, %v1562_v49  ;;  %v1168_v14 = vsel %vm931_vm3, %v1167_v22, %v1163_v21  ;;  %v1172_v36 = vrot.slane %v1142_v11, %v2095_v55  ;;  %v1060_v16 = vsel %vm938_vm4, %v1059_v1, %v1055_v25 }
 0x1ae   :  { %v1566_v61 = vpop.eup %1565  ;;  %vm1127_vm14 = vcmp.gt.f32.partialorder %v1564_v56, 0.5  ;;  %1579 = vrcp.f32 %v859_v59  ;;  %v1064_v29 = vrot.slane %v1564_v56, %v2100_v9  ;;  %v1023_v20 = vsel %vm1022_vm10, %v1021_v15, %v1016_v32 }
 0x1af   :  { %v2239_v0 = vpop.eup %1567  ;;  %v861_v13 = vadd.f32 1.0, %v1566_v61  ;;  %1581 = vpow2.f32 %v1341_v63  ;;  %v1143_v27 = vsel %vm1127_vm14, 1, %v1665_v40  ;;  %v1173_v35 = vsel %vm938_vm4, %v1172_v36, %v1168_v14  ;;  %1025 = vst [vmem:[#allocation3] sm:$0x1] %v1023_v20 }
 0x1b0   :  { %v1570_v6 = vpop.eup %1569  ;;  %vm1128_vm1 = vcmp.gt.f32.partialorder %v2239_v0, 0.5  ;;  %1583 = vrcp.f32 %v860_v4  ;;  %v1177_v33 = vrot.slane %v1143_v27, %v2100_v9  ;;  %v1069_v39 = vrot.slane %v2239_v0, %v2111_v2 }
 0x1b1   :  { %v862_v48 = vadd.f32 1.0, %v1570_v6  ;;  %v1572_v28 = vpop.eup %1571  ;;  %1585 = vrcp.f32 %v861_v13  ;;  %v1144_v18 = vsel %vm1128_vm1, 1, %v1665_v40  ;;  %v1065_v3 = vsel %vm945_vm5, %v1064_v29, %v1060_v16 }
 0x1b2   :  { %v1574_v31 = vpop.eup %1573  ;;  %1587 = vpow2.f32 %v1342_v26  ;;  %vm1129_vm2 = vcmp.gt.f32.partialorder %v1572_v28, 0.5 }
 0x1b3   :  { %1589 = vrcp.f32 %v862_v48  ;;  %v1576_v55 = vpop.eup %1575  ;;  %vm1130_vm3 = vcmp.gt.f32.partialorder %v1574_v31, 0.5 }
 0x1b4   :  { %1606 = shalt.err (!%p1603_p4)
}
 0x1b5   :  { %s1607_s0 = scalar_lea.hbm %s2376_s10, 16 }
 0x1b6   :  { %p1608_p5 = scmp.ne.s32.totalorder %s2376_s10, %s1607_s0  ;;  %p1611_p6 = scmp.lt.u32.totalorder %s1607_s0, %s2376_s10 }
 0x1b8   :  { %p1613_p7 = pnand %p1611_p6, %p1608_p5 }
 0x1ba   :  { %1616 = shalt.err (!%p1613_p7)
}
 0x1bb   :  { %1244 = dma.vmem_to_hbm [thread:$0]  %s1242_s9, 16, %s2376_s10, [#allocation4]   ;;  %v1578_v9 = vpop.eup %1577  ;;  %v1182_v41 = vrot.slane %v1144_v18, %v2111_v2  ;;  %v1178_v44 = vsel %vm945_vm5, %v1177_v33, %v1173_v35  ;;  %v1074_v45 = vrot.slane %v1572_v28, %v2123_v24  ;;  %v1145_v5 = vsel %vm1129_vm2, 1, %v1665_v40 }
 0x1bc   :  { %v1580_v42 = vpop.eup %1579  ;;  %v1070_v47 = vsel %vm952_vm6, %v1069_v39, %v1065_v3  ;;  %v1079_v49 = vrot.slane %v1574_v31, %v2133_v30  ;;  %v1146_v50 = vsel %vm1130_vm3, 1, %v1665_v40  ;;  %vm1131_vm4 = vcmp.gt.f32.partialorder %v1576_v55, 0.5  ;;  %s1667_s10 = smov [#allocation5]   ;;  %s1668_s29 = smov [#allocation7]  }
 0x1bd   :  { %v1582_v51 = vpop.eup %1581  ;;  %vm1132_vm12 = vcmp.gt.f32.partialorder %v1578_v9, 0.5  ;;  %v1183_v2 = vsel %vm952_vm6, %v1182_v41, %v1178_v44  ;;  %v1187_v54 = vrot.slane %v1145_v5, %v2123_v24  ;;  %v1075_v56 = vsel %vm959_vm7, %v1074_v45, %v1070_v47  ;;  %s1251_s28 = sshll.u32 %s1667_s10, 4  ;;  %s1261_s30 = sshll.u32 %s1668_s29, 4  ;;  %s1252_s28 = int_to_ptr.vmem [resolvable:$true] %s1251_s28  ;;  %s2333_s30 = int_to_ptr.vmem [resolvable:$true] %s1261_s30 }
 0x1be   :  { %v1584_v53 = vpop.eup %1583  ;;  %v863_v7 = vadd.f32 1.0, %v1582_v51  ;;  %v1192_v57 = vrot.slane %v1146_v50, %v2133_v30  ;;  %v1084_v58 = vrot.slane %v1576_v55, %v2143_v34  ;;  %v1147_v59 = vsel %vm1131_vm4, 1, %v1665_v40  ;;  %s1617_s13 = scalar_lea.vmem %s1252_s28, 16  ;;  %s1621_s14 = scalar_lea.vmem %s1252_s28, 32 }
 0x1bf   :  { %v1586_v61 = vpop.eup %1585  ;;  %v1080_v62 = vsel %vm966_vm8, %v1079_v49, %v1075_v56  ;;  %v1148_v52 = vsel %vm1132_vm12, 1, %v1665_v40  ;;  %vm1133_vm5 = vcmp.gt.f32.partialorder %v1580_v42, 0.5  ;;  %v1089_v0 = vrot.slane %v1578_v9, %v2152_v43  ;;  %p1618_p8 = scmp.ne.s32.totalorder %s1252_s28, %s1617_s13  ;;  %p1622_p9 = scmp.lt.s32.totalorder %s1252_s28, %s1252_s28 }
 0x1c0   :  { %1591 = vrcp.f32 %v863_v7  ;;  %v1588_v63 = vpop.eup %1587  ;;  %vm1134_vm6 = vcmp.gt.f32.partialorder %v1584_v53, 0.5  ;;  %v1188_v1 = vsel %vm959_vm7, %v1187_v54, %v1183_v2  ;;  %v1197_v30 = vrot.slane %v1147_v59, %v2143_v34  ;;  %p1623_p10 = scmp.lt.s32.totalorder %s1621_s14, %s1617_s13 }
 0x1c1   :  { %v1590_v24 = vpop.eup %1589  ;;  %v864_v4 = vadd.f32 1.0, %v1588_v63  ;;  %v1193_v46 = vsel %vm966_vm8, %v1192_v57, %v1188_v1  ;;  %v1085_v6 = vsel %vm973_vm9, %v1084_v58, %v1080_v62  ;;  %v1202_v11 = vrot.slane %v1148_v52, %v2152_v43 }
 0x1c2   :  { %v1149_v10 = vsel %vm1133_vm5, 1, %v1665_v40  ;;  %v1094_v22 = vrot.slane %v1580_v42, %v2170_v60  ;;  %v1150_v21 = vsel %vm1134_vm6, 1, %v1665_v40  ;;  %vm1135_vm14 = vcmp.gt.f32.partialorder %v1586_v61, 0.5  ;;  %p1624_p11 = por %p1623_p10, %p1622_p9 }
 0x1c3   :  { %1593 = vrcp.f32 %v864_v4  ;;  %vm2381_vm1 = vcmask 654912   ;;  %v1099_v23 = vrot.slane %v1584_v53, %v2182_v8  ;;  %vm1136_vm7 = vcmp.gt.f32.partialorder %v1590_v24, 0.5 }
 0x1c4   :  { %v1090_v13 = vsel %vm2381_vm1, %v1089_v0, %v1085_v6  ;;  %v1198_v34 = vsel %vm973_vm9, %v1197_v30, %v1193_v46  ;;  %v1207_v25 = vrot.slane %v1149_v10, %v2170_v60  ;;  %vm2382_vm8 = vmmov %vm2381_vm1  ;;  %v1212_v43 = vrot.slane %v1150_v21, %v2182_v8  ;;  %p1625_p12 = pnand %p1624_p11, %p1618_p8 }
 0x1c5   :  { %v1203_v26 = vsel %vm2382_vm8, %v1202_v11, %v1198_v34  ;;  %v1151_v19 = vsel %vm1135_vm14, 1, %v1665_v40  ;;  %vm2383_vm2 = vcmask 720512   ;;  %v1104_v48 = vrot.slane %v1586_v61, %v2185_v12 }
 0x1c6   :  { %v1095_v27 = vsel %vm2383_vm2, %v1094_v22, %v1090_v13  ;;  %v1152_v28 = vsel %vm1136_vm7, 1, %v1665_v40  ;;  %v1109_v29 = vrot.slane %v1590_v24, %v2205_v17  ;;  %vm2384_vm9 = vmmov %vm2383_vm2  ;;  %v1217_v60 = vrot.slane %v1151_v19, %v2185_v12 }
 0x1c7   :  { %v1100_v14 = vsel %vm994_vm13, %v1099_v23, %v1095_v27  ;;  %v1208_v31 = vsel %vm2384_vm9, %v1207_v25, %v1203_v26  ;;  %v1222_v36 = vrot.slane %v1152_v28, %v2205_v17 }
 0x1c8   :  { %v1213_v8 = vsel %vm994_vm13, %v1212_v43, %v1208_v31  ;;  %v1105_v16 = vsel %vm1001_vm15, %v1104_v48, %v1100_v14 }
 0x1c9   :  { %v1110_v18 = vsel %vm1008_vm0, %v1109_v29, %v1105_v16  ;;  %v1218_v35 = vsel %vm1001_vm15, %v1217_v60, %v1213_v8 }
 0x1ca   :  { %v1592_v15 = vpop.eup %1591  ;;  %v1223_v17 = vsel %vm1008_vm0, %v1222_v36, %v1218_v35 }
 0x1cb   :  { %vm1137_vm3 = vcmp.gt.f32.partialorder %v1592_v15, 0.5  ;;  %v1114_v32 = vrot.slane %v1592_v15, %v2211_v37 }
 0x1cc   :  { %v1153_v33 = vsel %vm1137_vm3, 1, %v1665_v40 }
 0x1cd   :  { %v1594_v20 = vpop.eup %1593  ;;  %v1227_v12 = vrot.slane %v1153_v33, %v2211_v37  ;;  %v1115_v55 = vsel %vm1015_vm11, %v1114_v32, %v1110_v18 }
 0x1ce   :  { %v1119_v39 = vrot.slane %v1594_v20, %v2214_v38  ;;  %vm1138_vm13 = vcmp.gt.f32.partialorder %v1594_v20, 0.5 }
 0x1cf   :  { %v1154_v3 = vsel %vm1138_vm13, 1, %v1665_v40  ;;  %v1228_v44 = vsel %vm1015_vm11, %v1227_v12, %v1223_v17 }
 0x1d0   :  { %v1120_v9 = vsel %vm1022_vm10, %v1119_v39, %v1115_v55  ;;  %v1232_v41 = vrot.slane %v1154_v3, %v2214_v38 }
 0x1d1   :  { %1122 = vst [vmem:[#allocation5] sm:$0x1] %v1120_v9 }
 0x1d2   :  { %1628 = shalt.err (!%p1625_p12)
}
 0x1d3   :  { %s1629_s1 = scalar_lea.hbm %s2377_s11, 16 }
 0x1d4   :  { %p1630_p13 = scmp.ne.s32.totalorder %s2377_s11, %s1629_s1  ;;  %p1633_p0 = scmp.lt.u32.totalorder %s1629_s1, %s2377_s11 }
 0x1d6   :  { %p1635_p1 = pnand %p1633_p0, %p1630_p13 }
 0x1d8   :  { %1638 = shalt.err (!%p1635_p1)
}
 0x1d9   :  { %1254 = dma.vmem_to_hbm [thread:$0]  %s1252_s28, 16, %s2377_s11, [#allocation6]   ;;  %v1233_v37 = vsel %vm1022_vm10, %v1232_v41, %v1228_v44 }
 0x1da   :  { %1234 = vst [vmem:[#allocation7] sm:$0x1] %v1233_v37  ;;  %s1639_s7 = scalar_lea.vmem %s2333_s30, 16  ;;  %s1643_s8 = scalar_lea.vmem %s2333_s30, 32 }
 0x1db   :  { %p1640_p2 = scmp.ne.s32.totalorder %s2333_s30, %s1639_s7  ;;  %p1644_p3 = scmp.lt.s32.totalorder %s2333_s30, %s2333_s30 }
 0x1dc   :  { %p1645_p4 = scmp.lt.s32.totalorder %s1643_s8, %s1639_s7 }
 0x1de   :  { %p1646_p5 = por %p1645_p4, %p1644_p3 }
 0x1e0   :  { %p1647_p6 = pnand %p1646_p5, %p1640_p2 }
 0x1e2   :  { %1650 = shalt.err (!%p1647_p6)
}
 0x1e3   :  { %s1651_s19 = scalar_lea.hbm %s2378_s12, 16 }
 0x1e4   :  { %p1652_p7 = scmp.ne.s32.totalorder %s2378_s12, %s1651_s19  ;;  %p1655_p8 = scmp.lt.u32.totalorder %s1651_s19, %s2378_s12 }
 0x1e6   :  { %p1657_p9 = pnand %p1655_p8, %p1652_p7 }
 0x1e8   :  { %1660 = shalt.err (!%p1657_p9)
}
 0x1e9   :  { %1264 = dma.vmem_to_hbm [thread:$0]  %s2333_s30, 16, %s2378_s12, [#allocation6]  }
 0x1ea   :  { %1661 = dma.done.wait [#allocation4], 16  }
 0x1eb   :  { %1662 = vsyncadd [#allocation4], 4294967280 }
 0x1ec   :  { %1663 = dma.done.wait [#allocation6], 32  }
 0x1ed   :  { %1664 = vsyncadd [#allocation6], 4294967264 }
 0x1ee   :  { %1274 = vsyncpa [#allocation4], 1 }
 0x1ef   :  { %1275 = vsyncpa [#allocation6], 1 }

</bundles_post_ra>
